<compile_context>
chip_gen: v7x
topology: tpu7x:2x2x1
jax: 0.10.0
libtpu: 0.0.40
codegen_flags: <defaults>
</compile_context>

<pallas_src>
import functools

import jax
import jax.numpy as jnp
from jax.experimental import pallas as pl
from jax.experimental.pallas import tpu as pltpu


def _soft(x, th):
    # self_active(x, th) = relu(x - th) - relu(-x - th)   (soft threshold)
    return jnp.maximum(x - th, 0.0) - jnp.maximum(-x - th, 0.0)


def _dladmm_kernel(
    beta1_ref, beta2_ref, beta3_ref, ss2_ref, ap_ref, ap1_ref,   # SMEM (K,) scalars
    a_ref, x_ref, w_ref, z0_ref, e0_ref, l0_ref,                 # VMEM blocked inputs
    zs_ref, es_ref, ls_ref,                                      # outputs (K+1, ., Bt)
):
    K = w_ref.shape[0]

    A = a_ref[...]            # (m, d)   compute dtype (f32 or bf16)
    X = x_ref[...]            # (m, Bt)  f32

    def mm(M, V):             # MXU matmul, f32 accumulation
        return jnp.dot(M, V.astype(M.dtype), preferred_element_type=jnp.float32)

    # Initial iterates for this batch tile (auto-pipelined VMEM inputs).
    Z = z0_ref[...]           # (d, Bt)
    E = e0_ref[...]           # (m, Bt)
    L = l0_ref[...]           # (m, Bt)
    zs_ref[0] = Z
    es_ref[0] = E
    ls_ref[0] = L

    # ---- layer 0 (peeled): keeps E0 / L0, only updates Z ------------------------
    T0 = mm(A, Z) + E - X
    Var = L + beta1_ref[0] * T0
    Z = _soft(Z - mm(w_ref[0], Var), ap_ref[0])
    zs_ref[1] = Z
    es_ref[1] = E
    ls_ref[1] = L

    # ---- layers 1..K-1: learned E / L / Z updates (unrolled, K is static) -------
    for k in range(1, K):
        AZ = mm(A, Z)
        VVar = L + beta2_ref[k - 1] * (AZ + E - X)
        E = _soft(E - ss2_ref[k - 1] * VVar, ap1_ref[k - 1])
        Tn = AZ + E - X
        L = L + beta3_ref[k - 1] * Tn
        Var = L + beta1_ref[k] * Tn
        Z = _soft(Z - mm(w_ref[k], Var), ap_ref[k])
        zs_ref[k + 1] = Z
        es_ref[k + 1] = E
        ls_ref[k + 1] = L


def _round_up(x, mult):
    return ((x + mult - 1) // mult) * mult


@functools.partial(jax.jit, static_argnames=("block_b", "compute_dtype"))
def dladmm_forward(A, X, Z0, E0, L0, W, beta1, beta2, beta3, ss2, ap, ap1,
                   *, block_b=512, compute_dtype=jnp.float32):
    """K unrolled learned-LADMM layers (use_learned=True, use_safeguard=False).

    Returns stacked iterates Z:(K+1,d,B), E:(K+1,m,B), L:(K+1,m,B); row 0 is the
    initial iterate (Z0/E0/L0) and row k+1 the output of layer k — i.e. exactly the
    (K+1)-long lists the PyTorch forward returns.
    """
    m, d = A.shape
    B = X.shape[1]
    K = W.shape[0]

    # Lane-dense batch tiling. Prefer >= 2 tiles when the batch allows it so the
    # "parallel" grid axis can shard across v7x's two TensorCores.
    b_min = _round_up(B, 128)
    bb = min(max(block_b // 128, 1) * 128, b_min)
    if b_min >= 256 and (B + bb - 1) // bb < 2:
        bb = max(128, ((b_min // 2) // 128) * 128)
    Bp = _round_up(B, bb)
    nb = Bp // bb
    pad = Bp - B

    X = X.astype(jnp.float32)
    Z0 = Z0.astype(jnp.float32)
    E0 = E0.astype(jnp.float32)
    L0 = L0.astype(jnp.float32)
    if pad:
        padc = ((0, 0), (0, pad))
        X = jnp.pad(X, padc)
        Z0 = jnp.pad(Z0, padc)
        E0 = jnp.pad(E0, padc)
        L0 = jnp.pad(L0, padc)

    A_c = A.astype(compute_dtype)
    W_c = W.astype(compute_dtype)

    smem = pl.BlockSpec(memory_space=pltpu.MemorySpace.SMEM)
    in_specs = [smem] * 6 + [
        pl.BlockSpec((m, d), lambda i: (0, 0)),          # A (resident, tiny)
        pl.BlockSpec((m, bb), lambda i: (0, i)),         # X batch tile
        pl.BlockSpec((K, d, m), lambda i: (0, 0, 0)),    # all layer weights resident
        pl.BlockSpec((d, bb), lambda i: (0, i)),         # Z0 tile (auto-pipelined)
        pl.BlockSpec((m, bb), lambda i: (0, i)),         # E0 tile
        pl.BlockSpec((m, bb), lambda i: (0, i)),         # L0 tile
    ]
    out_specs = [
        pl.BlockSpec((K + 1, d, bb), lambda i: (0, 0, i)),
        pl.BlockSpec((K + 1, m, bb), lambda i: (0, 0, i)),
        pl.BlockSpec((K + 1, m, bb), lambda i: (0, 0, i)),
    ]
    out_shape = [
        jax.ShapeDtypeStruct((K + 1, d, Bp), jnp.float32),
        jax.ShapeDtypeStruct((K + 1, m, Bp), jnp.float32),
        jax.ShapeDtypeStruct((K + 1, m, Bp), jnp.float32),
    ]

    # VMEM budget from the true (double-buffered) footprint, generation-aware cap.
    csize = jnp.dtype(compute_dtype).itemsize
    in_bytes = (m * d * csize + K * d * m * csize + (d + 3 * m) * bb * 4)
    out_bytes = (K + 1) * (d + 2 * m) * bb * 4
    est = 2 * (in_bytes + out_bytes)                 # 2 pipeline buffers per array
    try:
        cap = int(pltpu.get_tpu_info().vmem_capacity_bytes) * 3 // 4
    except Exception:  # pragma: no cover - conservative v7x-safe fallback
        cap = 48 << 20
    vmem_limit = int(min(max(est + est // 4 + (2 << 20), 16 << 20), max(cap, 16 << 20)))

    zs, es, ls = pl.pallas_call(
        _dladmm_kernel,
        grid=(nb,),
        in_specs=in_specs,
        out_specs=out_specs,
        out_shape=out_shape,
        compiler_params=pltpu.CompilerParams(
            dimension_semantics=("parallel",),       # batch tiles are independent
            vmem_limit_bytes=vmem_limit),
    )(beta1, beta2, beta3, ss2, ap, ap1, A_c, X, W_c, Z0, E0, L0)

    # Strip the batch padding.
    return zs[:, :, :B], es[:, :, :B], ls[:, :, :B]


def reference_forward(A, X, Z0, E0, L0, W, beta1, beta2, beta3, ss2, ap, ap1,
                      compute_dtype=jnp.float32):
    """Pure-JAX mirror of the PyTorch forward (use_learned=True, use_safeguard=False)."""
    hi = jax.lax.Precision.HIGHEST
    Ac = A.astype(compute_dtype)
    Wc = W.astype(compute_dtype)

    def mm(a, b):
        return jnp.dot(a, b.astype(a.dtype), precision=hi,
                       preferred_element_type=jnp.float32)

    K = W.shape[0]
    Z, E, L = [Z0], [E0], [L0]
    for k in range(K):
        Zk, Ek, Lk = Z[-1], E[-1], L[-1]
        if k == 0:
            T0 = mm(Ac, Zk) + Ek - X
            Var = Lk + beta1[0] * T0
            Zn = _soft(Zk - mm(Wc[0], Var), ap[0])
            En, Ln = Ek, Lk
        else:
            AZ = mm(Ac, Zk)
            VVar = Lk + beta2[k - 1] * (AZ + Ek - X)
            En = _soft(Ek - ss2[k - 1] * VVar, ap1[k - 1])
            Tn = AZ + En - X
            Ln = Lk + beta3[k - 1] * Tn
            Var = Ln + beta1[k] * Tn
            Zn = _soft(Zk - mm(Wc[k], Var), ap[k])
        Z.append(Zn); E.append(En); L.append(Ln)
    return Z, E, L


if __name__ == "__main__":
    # Small synthetic problem consistent with the module (m, d, batch_size=20, layers).
    m, n, d, batch_size, layers = 16, 32, 32, 20, 3

    key = jax.random.PRNGKey(0)
    k_a, k_x, k_z0, k_w = jax.random.split(key, 4)

    A = (jax.random.normal(k_a, (m, d), dtype=jnp.float32) / jnp.sqrt(m)).astype(jnp.float32)
    X = jax.random.normal(k_x, (m, batch_size), dtype=jnp.float32)
    Z0 = (1.0 / d) * jax.random.uniform(k_z0, (d, batch_size), dtype=jnp.float32)
    E0 = jnp.zeros((m, batch_size), jnp.float32)
    L0 = jnp.zeros((m, batch_size), jnp.float32)

    # fc[k].weight = A.t() + 0.001 * randn_like(A.t())
    W = (jnp.broadcast_to(A.T, (layers, d, m))
         + 0.001 * jax.random.normal(k_w, (layers, d, m), dtype=jnp.float32))

    # Per-layer learned scalars (module init is all-ones / 0.2 / 0.8; add small
    # deterministic per-layer offsets so the k / (k-1) scalar indexing is exercised).
    lay = jnp.arange(layers, dtype=jnp.float32)
    beta1 = 1.0 + 0.03 * lay
    beta2 = 1.0 + 0.02 * lay
    beta3 = 1.0 + 0.01 * lay
    ss2 = 1.0 - 0.05 * lay
    ap = 0.2 + 0.01 * lay     # active_para
    ap1 = 0.8 - 0.02 * lay    # active_para1

    # --- f32 kernel vs pure-JAX reference (tight tolerance) --------------------
    zs, es, ls = dladmm_forward(A, X, Z0, E0, L0, W,
                                beta1, beta2, beta3, ss2, ap, ap1)
    jax.block_until_ready((zs, es, ls))

    Zr, Er, Lr = reference_forward(A, X, Z0, E0, L0, W,
                                   beta1, beta2, beta3, ss2, ap, ap1)
    for i in range(layers + 1):
        assert jnp.allclose(zs[i], Zr[i], atol=1e-4, rtol=1e-4), f"Z[{i}] mismatch"
        assert jnp.allclose(es[i], Er[i], atol=1e-4, rtol=1e-4), f"E[{i}] mismatch"
        assert jnp.allclose(ls[i], Lr[i], atol=1e-4, rtol=1e-4), f"L[{i}] mismatch"

    # --- bf16 MXU inputs (A, W), f32 accumulation: coarse smoke test only ------
    # (ADMM iterates amplify rounding; this is NOT a correctness bound.)
    zs16, es16, ls16 = dladmm_forward(A, X, Z0, E0, L0, W,
                                      beta1, beta2, beta3, ss2, ap, ap1,
                                      compute_dtype=jnp.bfloat16)
    jax.block_until_ready((zs16, es16, ls16))
    assert bool(jnp.all(jnp.isfinite(zs16)) & jnp.all(jnp.isfinite(es16))
                & jnp.all(jnp.isfinite(ls16))), "non-finite bf16 output"
    err = max(float(jnp.max(jnp.abs(zs16[-1] - Zr[-1]))),
              float(jnp.max(jnp.abs(es16[-1] - Er[-1]))),
              float(jnp.max(jnp.abs(ls16[-1] - Lr[-1]))))
    assert err < 0.5, f"bf16 path drifted too far from f32 reference: {err}"

    # The (K+1)-long lists returned by the PyTorch forward are simply the rows:
    #   Z_list = [zs[i] for i in range(layers + 1)]   (row 0 == Z0), etc.
    print("KERNEL_OK")
</pallas_src>

<mosaic_0001>
module attributes {stable_mosaic.version = 11 : i64} {
  func.func @_dladmm_kernel(%arg0: i32, %arg1: memref<3xf32, #tpu.memory_space<smem>>, %arg2: memref<3xf32, #tpu.memory_space<smem>>, %arg3: memref<3xf32, #tpu.memory_space<smem>>, %arg4: memref<3xf32, #tpu.memory_space<smem>>, %arg5: memref<3xf32, #tpu.memory_space<smem>>, %arg6: memref<3xf32, #tpu.memory_space<smem>>, %arg7: memref<16x32xf32, #tpu.memory_space<vmem>>, %arg8: memref<16x128xf32, #tpu.memory_space<vmem>>, %arg9: memref<3x32x16xf32, #tpu.memory_space<vmem>>, %arg10: memref<32x128xf32, #tpu.memory_space<vmem>>, %arg11: memref<16x128xf32, #tpu.memory_space<vmem>>, %arg12: memref<16x128xf32, #tpu.memory_space<vmem>>, %arg13: memref<4x32x128xf32, #tpu.memory_space<vmem>>, %arg14: memref<4x16x128xf32, #tpu.memory_space<vmem>>, %arg15: memref<4x16x128xf32, #tpu.memory_space<vmem>>) attributes {dimension_semantics = [#tpu.dimension_semantics<parallel>], iteration_bounds = array<i64: 1>, scalar_prefetch = 0 : i64, scratch_operands = 0 : i64, tpu.core_type = #tpu.core_type<tc>, window_params = [{transform_indices = @transform_0, window_bounds = array<i64: 3>}, {transform_indices = @transform_1, window_bounds = array<i64: 3>}, {transform_indices = @transform_2, window_bounds = array<i64: 3>}, {transform_indices = @transform_3, window_bounds = array<i64: 3>}, {transform_indices = @transform_4, window_bounds = array<i64: 3>}, {transform_indices = @transform_5, window_bounds = array<i64: 3>}, {pipeline_mode = #tpu.pipeline_mode<synchronous>, transform_indices = @transform_6, window_bounds = array<i64: 16, 32>}, {transform_indices = @transform_7, window_bounds = array<i64: 16, 128>}, {pipeline_mode = #tpu.pipeline_mode<synchronous>, transform_indices = @transform_8, window_bounds = array<i64: 3, 32, 16>}, {transform_indices = @transform_9, window_bounds = array<i64: 32, 128>}, {transform_indices = @transform_10, window_bounds = array<i64: 16, 128>}, {transform_indices = @transform_11, window_bounds = array<i64: 16, 128>}, {transform_indices = @transform_12, window_bounds = array<i64: 4, 32, 128>}, {transform_indices = @transform_13, window_bounds = array<i64: 4, 16, 128>}, {transform_indices = @transform_14, window_bounds = array<i64: 4, 16, 128>}]} {
    %c0 = arith.constant 0 : index
    %c0_0 = arith.constant 0 : index
    %0 = vector.load %arg7[%c0, %c0_0] : memref<16x32xf32, #tpu.memory_space<vmem>>, vector<16x32xf32>
    %c0_1 = arith.constant 0 : index
    %c0_2 = arith.constant 0 : index
    %1 = vector.load %arg8[%c0_1, %c0_2] : memref<16x128xf32, #tpu.memory_space<vmem>>, vector<16x128xf32>
    %c0_3 = arith.constant 0 : index
    %c0_4 = arith.constant 0 : index
    %2 = vector.load %arg10[%c0_3, %c0_4] : memref<32x128xf32, #tpu.memory_space<vmem>>, vector<32x128xf32>
    %c0_5 = arith.constant 0 : index
    %c0_6 = arith.constant 0 : index
    %3 = vector.load %arg11[%c0_5, %c0_6] : memref<16x128xf32, #tpu.memory_space<vmem>>, vector<16x128xf32>
    %c0_7 = arith.constant 0 : index
    %c0_8 = arith.constant 0 : index
    %4 = vector.load %arg12[%c0_7, %c0_8] : memref<16x128xf32, #tpu.memory_space<vmem>>, vector<16x128xf32>
    %c0_9 = arith.constant 0 : index
    %c0_10 = arith.constant 0 : index
    %c0_11 = arith.constant 0 : index
    %5 = vector.load %arg13[%c0_9, %c0_10, %c0_11] : memref<4x32x128xf32, #tpu.memory_space<vmem>>, vector<1x32x128xf32>
    %6 = vector.shape_cast %5 : vector<1x32x128xf32> to vector<32x128xf32>
    %7 = vector.shape_cast %2 : vector<32x128xf32> to vector<1x32x128xf32>
    tpu.vector_store %arg13[%c0_9, %c0_10, %c0_11], %7 {strides = array<i32>} : memref<4x32x128xf32, #tpu.memory_space<vmem>>, vector<1x32x128xf32>,
    %c0_12 = arith.constant 0 : index
    %c0_13 = arith.constant 0 : index
    %c0_14 = arith.constant 0 : index
    %8 = vector.load %arg14[%c0_12, %c0_13, %c0_14] : memref<4x16x128xf32, #tpu.memory_space<vmem>>, vector<1x16x128xf32>
    %9 = vector.shape_cast %8 : vector<1x16x128xf32> to vector<16x128xf32>
    %10 = vector.shape_cast %3 : vector<16x128xf32> to vector<1x16x128xf32>
    tpu.vector_store %arg14[%c0_12, %c0_13, %c0_14], %10 {strides = array<i32>} : memref<4x16x128xf32, #tpu.memory_space<vmem>>, vector<1x16x128xf32>,
    %c0_15 = arith.constant 0 : index
    %c0_16 = arith.constant 0 : index
    %c0_17 = arith.constant 0 : index
    %11 = vector.load %arg15[%c0_15, %c0_16, %c0_17] : memref<4x16x128xf32, #tpu.memory_space<vmem>>, vector<1x16x128xf32>
    %12 = vector.shape_cast %11 : vector<1x16x128xf32> to vector<16x128xf32>
    %13 = vector.shape_cast %4 : vector<16x128xf32> to vector<1x16x128xf32>
    tpu.vector_store %arg15[%c0_15, %c0_16, %c0_17], %13 {strides = array<i32>} : memref<4x16x128xf32, #tpu.memory_space<vmem>>, vector<1x16x128xf32>,
    %cst = arith.constant dense<0.000000e+00> : vector<16x128xf32>
    %14 = tpu.matmul %0, %2, %cst {dimension_numbers = #tpu.dot_dimension_numbers<[1], [0], [0], [1], [0, 0, 1, 1], [], []>} : vector<16x32xf32>, vector<32x128xf32>, vector<16x128xf32> -> vector<16x128xf32>
    %15 = arith.addf %14, %3 : vector<16x128xf32>
    %16 = arith.subf %15, %1 : vector<16x128xf32>
    %c0_18 = arith.constant 0 : index
    %17 = memref.load %arg1[%c0_18] : memref<3xf32, #tpu.memory_space<smem>>
    %18 = vector.broadcast %17 : f32 to vector<16x128xf32>
    %19 = arith.mulf %18, %16 : vector<16x128xf32>
    %20 = arith.addf %4, %19 : vector<16x128xf32>
    %c0_19 = arith.constant 0 : index
    %c0_20 = arith.constant 0 : index
    %c0_21 = arith.constant 0 : index
    %21 = vector.load %arg9[%c0_19, %c0_20, %c0_21] : memref<3x32x16xf32, #tpu.memory_space<vmem>>, vector<1x32x16xf32>
    %22 = vector.shape_cast %21 : vector<1x32x16xf32> to vector<32x16xf32>
    %cst_22 = arith.constant dense<0.000000e+00> : vector<32x128xf32>
    %23 = tpu.matmul %22, %20, %cst_22 {dimension_numbers = #tpu.dot_dimension_numbers<[1], [0], [0], [1], [0, 0, 1, 1], [], []>} : vector<32x16xf32>, vector<16x128xf32>, vector<32x128xf32> -> vector<32x128xf32>
    %24 = arith.subf %2, %23 : vector<32x128xf32>
    %c0_23 = arith.constant 0 : index
    %25 = memref.load %arg5[%c0_23] : memref<3xf32, #tpu.memory_space<smem>>
    %26 = vector.broadcast %25 : f32 to vector<32x128xf32>
    %27 = arith.subf %24, %26 : vector<32x128xf32>
    %cst_24 = arith.constant 0.000000e+00 : f32
    %28 = vector.broadcast %cst_24 : f32 to vector<32x128xf32>
    %29 = arith.maximumf %27, %28 : vector<32x128xf32>
    %cst_25 = arith.constant 0.000000e+00 : f32
    %30 = vector.broadcast %cst_25 : f32 to vector<32x128xf32>
    %31 = arith.subf %30, %24 : vector<32x128xf32>
    %32 = vector.broadcast %25 : f32 to vector<32x128xf32>
    %33 = arith.subf %31, %32 : vector<32x128xf32>
    %cst_26 = arith.constant 0.000000e+00 : f32
    %34 = vector.broadcast %cst_26 : f32 to vector<32x128xf32>
    %35 = arith.maximumf %33, %34 : vector<32x128xf32>
    %36 = arith.subf %29, %35 : vector<32x128xf32>
    %c1 = arith.constant 1 : index
    %c0_27 = arith.constant 0 : index
    %c0_28 = arith.constant 0 : index
    %37 = vector.load %arg13[%c1, %c0_27, %c0_28] : memref<4x32x128xf32, #tpu.memory_space<vmem>>, vector<1x32x128xf32>
    %38 = vector.shape_cast %37 : vector<1x32x128xf32> to vector<32x128xf32>
    %39 = vector.shape_cast %36 : vector<32x128xf32> to vector<1x32x128xf32>
    tpu.vector_store %arg13[%c1, %c0_27, %c0_28], %39 {strides = array<i32>} : memref<4x32x128xf32, #tpu.memory_space<vmem>>, vector<1x32x128xf32>,
    %c1_29 = arith.constant 1 : index
    %c0_30 = arith.constant 0 : index
    %c0_31 = arith.constant 0 : index
    %40 = vector.load %arg14[%c1_29, %c0_30, %c0_31] : memref<4x16x128xf32, #tpu.memory_space<vmem>>, vector<1x16x128xf32>
    %41 = vector.shape_cast %40 : vector<1x16x128xf32> to vector<16x128xf32>
    %42 = vector.shape_cast %3 : vector<16x128xf32> to vector<1x16x128xf32>
    tpu.vector_store %arg14[%c1_29, %c0_30, %c0_31], %42 {strides = array<i32>} : memref<4x16x128xf32, #tpu.memory_space<vmem>>, vector<1x16x128xf32>,
    %c1_32 = arith.constant 1 : index
    %c0_33 = arith.constant 0 : index
    %c0_34 = arith.constant 0 : index
    %43 = vector.load %arg15[%c1_32, %c0_33, %c0_34] : memref<4x16x128xf32, #tpu.memory_space<vmem>>, vector<1x16x128xf32>
    %44 = vector.shape_cast %43 : vector<1x16x128xf32> to vector<16x128xf32>
    %45 = vector.shape_cast %4 : vector<16x128xf32> to vector<1x16x128xf32>
    tpu.vector_store %arg15[%c1_32, %c0_33, %c0_34], %45 {strides = array<i32>} : memref<4x16x128xf32, #tpu.memory_space<vmem>>, vector<1x16x128xf32>,
    %cst_35 = arith.constant dense<0.000000e+00> : vector<16x128xf32>
    %46 = tpu.matmul %0, %36, %cst_35 {dimension_numbers = #tpu.dot_dimension_numbers<[1], [0], [0], [1], [0, 0, 1, 1], [], []>} : vector<16x32xf32>, vector<32x128xf32>, vector<16x128xf32> -> vector<16x128xf32>
    %c0_36 = arith.constant 0 : index
    %47 = memref.load %arg2[%c0_36] : memref<3xf32, #tpu.memory_space<smem>>
    %48 = arith.addf %46, %3 : vector<16x128xf32>
    %49 = arith.subf %48, %1 : vector<16x128xf32>
    %50 = vector.broadcast %47 : f32 to vector<16x128xf32>
    %51 = arith.mulf %50, %49 : vector<16x128xf32>
    %52 = arith.addf %4, %51 : vector<16x128xf32>
    %c0_37 = arith.constant 0 : index
    %53 = memref.load %arg4[%c0_37] : memref<3xf32, #tpu.memory_space<smem>>
    %54 = vector.broadcast %53 : f32 to vector<16x128xf32>
    %55 = arith.mulf %54, %52 : vector<16x128xf32>
    %56 = arith.subf %3, %55 : vector<16x128xf32>
    %c0_38 = arith.constant 0 : index
    %57 = memref.load %arg6[%c0_38] : memref<3xf32, #tpu.memory_space<smem>>
    %58 = vector.broadcast %57 : f32 to vector<16x128xf32>
    %59 = arith.subf %56, %58 : vector<16x128xf32>
    %cst_39 = arith.constant 0.000000e+00 : f32
    %60 = vector.broadcast %cst_39 : f32 to vector<16x128xf32>
    %61 = arith.maximumf %59, %60 : vector<16x128xf32>
    %cst_40 = arith.constant 0.000000e+00 : f32
    %62 = vector.broadcast %cst_40 : f32 to vector<16x128xf32>
    %63 = arith.subf %62, %56 : vector<16x128xf32>
    %64 = vector.broadcast %57 : f32 to vector<16x128xf32>
    %65 = arith.subf %63, %64 : vector<16x128xf32>
    %cst_41 = arith.constant 0.000000e+00 : f32
    %66 = vector.broadcast %cst_41 : f32 to vector<16x128xf32>
    %67 = arith.maximumf %65, %66 : vector<16x128xf32>
    %68 = arith.subf %61, %67 : vector<16x128xf32>
    %69 = arith.addf %46, %68 : vector<16x128xf32>
    %70 = arith.subf %69, %1 : vector<16x128xf32>
    %c0_42 = arith.constant 0 : index
    %71 = memref.load %arg3[%c0_42] : memref<3xf32, #tpu.memory_space<smem>>
    %72 = vector.broadcast %71 : f32 to vector<16x128xf32>
    %73 = arith.mulf %72, %70 : vector<16x128xf32>
    %74 = arith.addf %4, %73 : vector<16x128xf32>
    %c1_43 = arith.constant 1 : index
    %75 = memref.load %arg1[%c1_43] : memref<3xf32, #tpu.memory_space<smem>>
    %76 = vector.broadcast %75 : f32 to vector<16x128xf32>
    %77 = arith.mulf %76, %70 : vector<16x128xf32>
    %78 = arith.addf %74, %77 : vector<16x128xf32>
    %c1_44 = arith.constant 1 : index
    %c0_45 = arith.constant 0 : index
    %c0_46 = arith.constant 0 : index
    %79 = vector.load %arg9[%c1_44, %c0_45, %c0_46] : memref<3x32x16xf32, #tpu.memory_space<vmem>>, vector<1x32x16xf32>
    %80 = vector.shape_cast %79 : vector<1x32x16xf32> to vector<32x16xf32>
    %cst_47 = arith.constant dense<0.000000e+00> : vector<32x128xf32>
    %81 = tpu.matmul %80, %78, %cst_47 {dimension_numbers = #tpu.dot_dimension_numbers<[1], [0], [0], [1], [0, 0, 1, 1], [], []>} : vector<32x16xf32>, vector<16x128xf32>, vector<32x128xf32> -> vector<32x128xf32>
    %82 = arith.subf %36, %81 : vector<32x128xf32>
    %c1_48 = arith.constant 1 : index
    %83 = memref.load %arg5[%c1_48] : memref<3xf32, #tpu.memory_space<smem>>
    %84 = vector.broadcast %83 : f32 to vector<32x128xf32>
    %85 = arith.subf %82, %84 : vector<32x128xf32>
    %cst_49 = arith.constant 0.000000e+00 : f32
    %86 = vector.broadcast %cst_49 : f32 to vector<32x128xf32>
    %87 = arith.maximumf %85, %86 : vector<32x128xf32>
    %cst_50 = arith.constant 0.000000e+00 : f32
    %88 = vector.broadcast %cst_50 : f32 to vector<32x128xf32>
    %89 = arith.subf %88, %82 : vector<32x128xf32>
    %90 = vector.broadcast %83 : f32 to vector<32x128xf32>
    %91 = arith.subf %89, %90 : vector<32x128xf32>
    %cst_51 = arith.constant 0.000000e+00 : f32
    %92 = vector.broadcast %cst_51 : f32 to vector<32x128xf32>
    %93 = arith.maximumf %91, %92 : vector<32x128xf32>
    %94 = arith.subf %87, %93 : vector<32x128xf32>
    %c2 = arith.constant 2 : index
    %c0_52 = arith.constant 0 : index
    %c0_53 = arith.constant 0 : index
    %95 = vector.load %arg13[%c2, %c0_52, %c0_53] : memref<4x32x128xf32, #tpu.memory_space<vmem>>, vector<1x32x128xf32>
    %96 = vector.shape_cast %95 : vector<1x32x128xf32> to vector<32x128xf32>
    %97 = vector.shape_cast %94 : vector<32x128xf32> to vector<1x32x128xf32>
    tpu.vector_store %arg13[%c2, %c0_52, %c0_53], %97 {strides = array<i32>} : memref<4x32x128xf32, #tpu.memory_space<vmem>>, vector<1x32x128xf32>,
    %c2_54 = arith.constant 2 : index
    %c0_55 = arith.constant 0 : index
    %c0_56 = arith.constant 0 : index
    %98 = vector.load %arg14[%c2_54, %c0_55, %c0_56] : memref<4x16x128xf32, #tpu.memory_space<vmem>>, vector<1x16x128xf32>
    %99 = vector.shape_cast %98 : vector<1x16x128xf32> to vector<16x128xf32>
    %100 = vector.shape_cast %68 : vector<16x128xf32> to vector<1x16x128xf32>
    tpu.vector_store %arg14[%c2_54, %c0_55, %c0_56], %100 {strides = array<i32>} : memref<4x16x128xf32, #tpu.memory_space<vmem>>, vector<1x16x128xf32>,
    %c2_57 = arith.constant 2 : index
    %c0_58 = arith.constant 0 : index
    %c0_59 = arith.constant 0 : index
    %101 = vector.load %arg15[%c2_57, %c0_58, %c0_59] : memref<4x16x128xf32, #tpu.memory_space<vmem>>, vector<1x16x128xf32>
    %102 = vector.shape_cast %101 : vector<1x16x128xf32> to vector<16x128xf32>
    %103 = vector.shape_cast %74 : vector<16x128xf32> to vector<1x16x128xf32>
    tpu.vector_store %arg15[%c2_57, %c0_58, %c0_59], %103 {strides = array<i32>} : memref<4x16x128xf32, #tpu.memory_space<vmem>>, vector<1x16x128xf32>,
    %cst_60 = arith.constant dense<0.000000e+00> : vector<16x128xf32>
    %104 = tpu.matmul %0, %94, %cst_60 {dimension_numbers = #tpu.dot_dimension_numbers<[1], [0], [0], [1], [0, 0, 1, 1], [], []>} : vector<16x32xf32>, vector<32x128xf32>, vector<16x128xf32> -> vector<16x128xf32>
    %c1_61 = arith.constant 1 : index
    %105 = memref.load %arg2[%c1_61] : memref<3xf32, #tpu.memory_space<smem>>
    %106 = arith.addf %104, %68 : vector<16x128xf32>
    %107 = arith.subf %106, %1 : vector<16x128xf32>
    %108 = vector.broadcast %105 : f32 to vector<16x128xf32>
    %109 = arith.mulf %108, %107 : vector<16x128xf32>
    %110 = arith.addf %74, %109 : vector<16x128xf32>
    %c1_62 = arith.constant 1 : index
    %111 = memref.load %arg4[%c1_62] : memref<3xf32, #tpu.memory_space<smem>>
    %112 = vector.broadcast %111 : f32 to vector<16x128xf32>
    %113 = arith.mulf %112, %110 : vector<16x128xf32>
    %114 = arith.subf %68, %113 : vector<16x128xf32>
    %c1_63 = arith.constant 1 : index
    %115 = memref.load %arg6[%c1_63] : memref<3xf32, #tpu.memory_space<smem>>
    %116 = vector.broadcast %115 : f32 to vector<16x128xf32>
    %117 = arith.subf %114, %116 : vector<16x128xf32>
    %cst_64 = arith.constant 0.000000e+00 : f32
    %118 = vector.broadcast %cst_64 : f32 to vector<16x128xf32>
    %119 = arith.maximumf %117, %118 : vector<16x128xf32>
    %cst_65 = arith.constant 0.000000e+00 : f32
    %120 = vector.broadcast %cst_65 : f32 to vector<16x128xf32>
    %121 = arith.subf %120, %114 : vector<16x128xf32>
    %122 = vector.broadcast %115 : f32 to vector<16x128xf32>
    %123 = arith.subf %121, %122 : vector<16x128xf32>
    %cst_66 = arith.constant 0.000000e+00 : f32
    %124 = vector.broadcast %cst_66 : f32 to vector<16x128xf32>
    %125 = arith.maximumf %123, %124 : vector<16x128xf32>
    %126 = arith.subf %119, %125 : vector<16x128xf32>
    %127 = arith.addf %104, %126 : vector<16x128xf32>
    %128 = arith.subf %127, %1 : vector<16x128xf32>
    %c1_67 = arith.constant 1 : index
    %129 = memref.load %arg3[%c1_67] : memref<3xf32, #tpu.memory_space<smem>>
    %130 = vector.broadcast %129 : f32 to vector<16x128xf32>
    %131 = arith.mulf %130, %128 : vector<16x128xf32>
    %132 = arith.addf %74, %131 : vector<16x128xf32>
    %c2_68 = arith.constant 2 : index
    %133 = memref.load %arg1[%c2_68] : memref<3xf32, #tpu.memory_space<smem>>
    %134 = vector.broadcast %133 : f32 to vector<16x128xf32>
    %135 = arith.mulf %134, %128 : vector<16x128xf32>
    %136 = arith.addf %132, %135 : vector<16x128xf32>
    %c2_69 = arith.constant 2 : index
    %c0_70 = arith.constant 0 : index
    %c0_71 = arith.constant 0 : index
    %137 = vector.load %arg9[%c2_69, %c0_70, %c0_71] : memref<3x32x16xf32, #tpu.memory_space<vmem>>, vector<1x32x16xf32>
    %138 = vector.shape_cast %137 : vector<1x32x16xf32> to vector<32x16xf32>
    %cst_72 = arith.constant dense<0.000000e+00> : vector<32x128xf32>
    %139 = tpu.matmul %138, %136, %cst_72 {dimension_numbers = #tpu.dot_dimension_numbers<[1], [0], [0], [1], [0, 0, 1, 1], [], []>} : vector<32x16xf32>, vector<16x128xf32>, vector<32x128xf32> -> vector<32x128xf32>
    %140 = arith.subf %94, %139 : vector<32x128xf32>
    %c2_73 = arith.constant 2 : index
    %141 = memref.load %arg5[%c2_73] : memref<3xf32, #tpu.memory_space<smem>>
    %142 = vector.broadcast %141 : f32 to vector<32x128xf32>
    %143 = arith.subf %140, %142 : vector<32x128xf32>
    %cst_74 = arith.constant 0.000000e+00 : f32
    %144 = vector.broadcast %cst_74 : f32 to vector<32x128xf32>
    %145 = arith.maximumf %143, %144 : vector<32x128xf32>
    %cst_75 = arith.constant 0.000000e+00 : f32
    %146 = vector.broadcast %cst_75 : f32 to vector<32x128xf32>
    %147 = arith.subf %146, %140 : vector<32x128xf32>
    %148 = vector.broadcast %141 : f32 to vector<32x128xf32>
    %149 = arith.subf %147, %148 : vector<32x128xf32>
    %cst_76 = arith.constant 0.000000e+00 : f32
    %150 = vector.broadcast %cst_76 : f32 to vector<32x128xf32>
    %151 = arith.maximumf %149, %150 : vector<32x128xf32>
    %152 = arith.subf %145, %151 : vector<32x128xf32>
    %c3 = arith.constant 3 : index
    %c0_77 = arith.constant 0 : index
    %c0_78 = arith.constant 0 : index
    %153 = vector.load %arg13[%c3, %c0_77, %c0_78] : memref<4x32x128xf32, #tpu.memory_space<vmem>>, vector<1x32x128xf32>
    %154 = vector.shape_cast %153 : vector<1x32x128xf32> to vector<32x128xf32>
    %155 = vector.shape_cast %152 : vector<32x128xf32> to vector<1x32x128xf32>
    tpu.vector_store %arg13[%c3, %c0_77, %c0_78], %155 {strides = array<i32>} : memref<4x32x128xf32, #tpu.memory_space<vmem>>, vector<1x32x128xf32>,
    %c3_79 = arith.constant 3 : index
    %c0_80 = arith.constant 0 : index
    %c0_81 = arith.constant 0 : index
    %156 = vector.load %arg14[%c3_79, %c0_80, %c0_81] : memref<4x16x128xf32, #tpu.memory_space<vmem>>, vector<1x16x128xf32>
    %157 = vector.shape_cast %156 : vector<1x16x128xf32> to vector<16x128xf32>
    %158 = vector.shape_cast %126 : vector<16x128xf32> to vector<1x16x128xf32>
    tpu.vector_store %arg14[%c3_79, %c0_80, %c0_81], %158 {strides = array<i32>} : memref<4x16x128xf32, #tpu.memory_space<vmem>>, vector<1x16x128xf32>,
    %c3_82 = arith.constant 3 : index
    %c0_83 = arith.constant 0 : index
    %c0_84 = arith.constant 0 : index
    %159 = vector.load %arg15[%c3_82, %c0_83, %c0_84] : memref<4x16x128xf32, #tpu.memory_space<vmem>>, vector<1x16x128xf32>
    %160 = vector.shape_cast %159 : vector<1x16x128xf32> to vector<16x128xf32>
    %161 = vector.shape_cast %132 : vector<16x128xf32> to vector<1x16x128xf32>
    tpu.vector_store %arg15[%c3_82, %c0_83, %c0_84], %161 {strides = array<i32>} : memref<4x16x128xf32, #tpu.memory_space<vmem>>, vector<1x16x128xf32>,
    return
  }
  func.func @transform_0(%arg0: i32) -> i32 {
    %c0_i32 = arith.constant 0 : i32
    %c0_i32_0 = arith.constant 0 : i32
    return %c0_i32 : i32
  }
  func.func @transform_1(%arg0: i32) -> i32 {
    %c0_i32 = arith.constant 0 : i32
    %c0_i32_0 = arith.constant 0 : i32
    return %c0_i32 : i32
  }
  func.func @transform_2(%arg0: i32) -> i32 {
    %c0_i32 = arith.constant 0 : i32
    %c0_i32_0 = arith.constant 0 : i32
    return %c0_i32 : i32
  }
  func.func @transform_3(%arg0: i32) -> i32 {
    %c0_i32 = arith.constant 0 : i32
    %c0_i32_0 = arith.constant 0 : i32
    return %c0_i32 : i32
  }
  func.func @transform_4(%arg0: i32) -> i32 {
    %c0_i32 = arith.constant 0 : i32
    %c0_i32_0 = arith.constant 0 : i32
    return %c0_i32 : i32
  }
  func.func @transform_5(%arg0: i32) -> i32 {
    %c0_i32 = arith.constant 0 : i32
    %c0_i32_0 = arith.constant 0 : i32
    return %c0_i32 : i32
  }
  func.func @transform_6(%arg0: i32) -> (i32, i32) {
    %c0_i32 = arith.constant 0 : i32
    %c0_i32_0 = arith.constant 0 : i32
    %c0_i32_1 = arith.constant 0 : i32
    return %c0_i32, %c0_i32_0 : i32, i32
  }
  func.func @transform_7(%arg0: i32) -> (i32, i32) {
    %c0_i32 = arith.constant 0 : i32
    %c0_i32_0 = arith.constant 0 : i32
    return %c0_i32, %arg0 : i32, i32
  }
  func.func @transform_8(%arg0: i32) -> (i32, i32, i32) {
    %c0_i32 = arith.constant 0 : i32
    %c0_i32_0 = arith.constant 0 : i32
    %c0_i32_1 = arith.constant 0 : i32
    %c0_i32_2 = arith.constant 0 : i32
    return %c0_i32, %c0_i32_0, %c0_i32_1 : i32, i32, i32
  }
  func.func @transform_9(%arg0: i32) -> (i32, i32) {
    %c0_i32 = arith.constant 0 : i32
    %c0_i32_0 = arith.constant 0 : i32
    return %c0_i32, %arg0 : i32, i32
  }
  func.func @transform_10(%arg0: i32) -> (i32, i32) {
    %c0_i32 = arith.constant 0 : i32
    %c0_i32_0 = arith.constant 0 : i32
    return %c0_i32, %arg0 : i32, i32
  }
  func.func @transform_11(%arg0: i32) -> (i32, i32) {
    %c0_i32 = arith.constant 0 : i32
    %c0_i32_0 = arith.constant 0 : i32
    return %c0_i32, %arg0 : i32, i32
  }
  func.func @transform_12(%arg0: i32) -> (i32, i32, i32) {
    %c0_i32 = arith.constant 0 : i32
    %c0_i32_0 = arith.constant 0 : i32
    %c0_i32_1 = arith.constant 0 : i32
    return %c0_i32, %c0_i32_0, %arg0 : i32, i32, i32
  }
  func.func @transform_13(%arg0: i32) -> (i32, i32, i32) {
    %c0_i32 = arith.constant 0 : i32
    %c0_i32_0 = arith.constant 0 : i32
    %c0_i32_1 = arith.constant 0 : i32
    return %c0_i32, %c0_i32_0, %arg0 : i32, i32, i32
  }
  func.func @transform_14(%arg0: i32) -> (i32, i32, i32) {
    %c0_i32 = arith.constant 0 : i32
    %c0_i32_0 = arith.constant 0 : i32
    %c0_i32_1 = arith.constant 0 : i32
    return %c0_i32, %c0_i32_0, %arg0 : i32, i32, i32
  }
}

</mosaic_0001>

<bundles_post_ra>
// kernel: dladmm_forward.1
= control target key start
LH: loop header
LB: loop body
LE: loop exit
PB: predicated region body
PF: predicated region fallthrough
CT: control target
= control target key end

     0   :  { %20 = vsyncpa [#allocation4], 0  ;;  %s1660_s0 = inlined_call_operand.vmem [shape: f32[3], index: 0, kind: input, shape index: {}]   ;;  %s1661_s1 = inlined_call_operand.vmem [shape: f32[3], index: 1, kind: input, shape index: {}]   ;;  %s1662_s2 = inlined_call_operand.vmem [shape: f32[3], index: 2, kind: input, shape index: {}]   ;;  %s1663_s3 = inlined_call_operand.vmem [shape: f32[3], index: 3, kind: input, shape index: {}]   ;;  %s1664_s4 = inlined_call_operand.vmem [shape: f32[3], index: 4, kind: input, shape index: {}]   ;;  %s1665_s5 = inlined_call_operand.vmem [shape: f32[3], index: 5, kind: input, shape index: {}]   ;;  %s1666_s6 = inlined_call_operand.vmem [shape: f32[16,32], index: 6, kind: input, shape index: {}]   ;;  %s1667_s7 = inlined_call_operand.vmem [shape: f32[16,128], index: 7, kind: input, shape index: {}]   ;;  %s1668_s8 = inlined_call_operand.vmem [shape: f32[3,32,16], index: 8, kind: input, shape index: {}]   ;;  %s1669_s9 = inlined_call_operand.vmem [shape: f32[32,128], index: 9, kind: input, shape index: {}]   ;;  %s1670_s10 = inlined_call_operand.vmem [shape: f32[16,128], index: 10, kind: input, shape index: {}]   ;;  %s1671_s11 = inlined_call_operand.vmem [shape: f32[16,128], index: 11, kind: input, shape index: {}]   ;;  %s1672_s12 = inlined_call_operand.vmem [shape: f32[4,32,128], index: 12, kind: output, shape index: {0}]   ;;  %s1673_s13 = inlined_call_operand.hbm [shape: f32[4,16,128], index: 13, kind: output, shape index: {1}]   ;;  %s1674_s14 = inlined_call_operand.hbm [shape: f32[4,16,128], index: 14, kind: output, shape index: {2}]  }
   0x1   :  { %21 = vsyncpa [#allocation6], 0 }
   0x2   :  { %22 = vsyncpa [#allocation9], 0 }
   0x3   :  { %23 = vsyncpa [#allocation12], 0 }
   0x4   :  { %24 = vsyncpa [#allocation3], 0  ;;  %s42_s15 = sshll.u32 %s1661_s1, 4  ;;  %s43_s15 = int_to_ptr.vmem [resolvable:$true] %s42_s15 }
   0x5   :  { %25 = vsyncpa [#allocation15], 0  ;;  %s62_s18 = sshll.u32 %s1663_s3, 4  ;;  %s1129_s19 = scalar_lea.vmem %s43_s15, 16  ;;  %s63_s18 = int_to_ptr.vmem [resolvable:$true] %s62_s18 }
   0x6   :  { %p1130_p0 = scmp.ne.s32.totalorder %s43_s15, %s1129_s19  ;;  %p1134_p1 = scmp.lt.s32.totalorder %s43_s15, %s43_s15 }
   0x7   :  { %p1135_p2 = scmp.lt.s32.totalorder %s1129_s19, %s1129_s19 }
   0x9   :  { %p1136_p3 = por %p1135_p2, %p1134_p1 }
   0xb   :  { %p1137_p4 = pnand %p1136_p3, %p1130_p0 }
   0xd   :  { %1140 = shalt.err (!%p1137_p4)
}
   0xe   :  { %s1257_s20 = smov [#allocation5]   ;;  %s1141_s21 = scalar_lea.vmem %s63_s18, 16 }
   0xf   :  { %45 = dma.vmem_to_smem %s43_s15, 16, %s1257_s20, [#allocation6]  }
  0x10   :  { %p1142_p5 = scmp.ne.s32.totalorder %s63_s18, %s1141_s21  ;;  %p1146_p6 = scmp.lt.s32.totalorder %s63_s18, %s63_s18 }
  0x11   :  { %p1147_p7 = scmp.lt.s32.totalorder %s1141_s21, %s1141_s21 }
  0x13   :  { %p1148_p8 = por %p1147_p7, %p1146_p6 }
  0x15   :  { %p1149_p9 = pnand %p1148_p8, %p1142_p5 }
  0x17   :  { %1152 = shalt.err (!%p1149_p9)
}
  0x18   :  { %s1258_s1 = smov [#allocation8]   ;;  %s32_s23 = sshll.u32 %s1660_s0, 4  ;;  %s33_s23 = int_to_ptr.vmem [resolvable:$true] %s32_s23 }
  0x19   :  { %65 = dma.vmem_to_smem %s63_s18, 16, %s1258_s1, [#allocation9]  }
  0x1a   :  { %s52_s26 = sshll.u32 %s1662_s2, 4  ;;  %s1153_s27 = scalar_lea.vmem %s33_s23, 16  ;;  %s53_s26 = int_to_ptr.vmem [resolvable:$true] %s52_s26 }
  0x1b   :  { %p1154_p10 = scmp.ne.s32.totalorder %s33_s23, %s1153_s27  ;;  %p1158_p11 = scmp.lt.s32.totalorder %s33_s23, %s33_s23 }
  0x1c   :  { %p1159_p12 = scmp.lt.s32.totalorder %s1153_s27, %s1153_s27 }
  0x1e   :  { %p1160_p13 = por %p1159_p12, %p1158_p11 }
  0x20   :  { %p1161_p0 = pnand %p1160_p13, %p1154_p10 }
  0x22   :  { %1164 = shalt.err (!%p1161_p0)
}
  0x23   :  { %s1259_s28 = smov [#allocation2]   ;;  %s1165_s29 = scalar_lea.vmem %s53_s26, 16 }
  0x24   :  { %35 = dma.vmem_to_smem %s33_s23, 16, %s1259_s28, [#allocation4]  }
  0x25   :  { %p1166_p1 = scmp.ne.s32.totalorder %s53_s26, %s1165_s29  ;;  %p1170_p2 = scmp.lt.s32.totalorder %s53_s26, %s53_s26 }
  0x26   :  { %p1171_p3 = scmp.lt.s32.totalorder %s1165_s29, %s1165_s29 }
  0x28   :  { %p1172_p4 = por %p1171_p3, %p1170_p2 }
  0x2a   :  { %p1173_p5 = pnand %p1172_p4, %p1166_p1 }
  0x2c   :  { %1176 = shalt.err (!%p1173_p5)
}
  0x2d   :  { %s1260_s0 = smov [#allocation7]   ;;  %s72_s15 = sshll.u32 %s1664_s4, 4  ;;  %s73_s15 = int_to_ptr.vmem [resolvable:$true] %s72_s15 }
  0x2e   :  { %55 = dma.vmem_to_smem %s53_s26, 16, %s1260_s0, [#allocation6]  }
  0x2f   :  { %s82_s18 = sshll.u32 %s1665_s5, 4  ;;  %s1177_s19 = scalar_lea.vmem %s73_s15, 16  ;;  %s83_s18 = int_to_ptr.vmem [resolvable:$true] %s82_s18 }
  0x30   :  { %p1178_p6 = scmp.ne.s32.totalorder %s73_s15, %s1177_s19  ;;  %p1182_p7 = scmp.lt.s32.totalorder %s73_s15, %s73_s15 }
  0x31   :  { %p1183_p8 = scmp.lt.s32.totalorder %s1177_s19, %s1177_s19 }
  0x33   :  { %p1184_p9 = por %p1183_p8, %p1182_p7 }
  0x35   :  { %p1185_p10 = pnand %p1184_p9, %p1178_p6 }
  0x37   :  { %1188 = shalt.err (!%p1185_p10)
}
  0x38   :  { %s1261_s20 = smov [#allocation10]   ;;  %s1189_s21 = scalar_lea.vmem %s83_s18, 16 }
  0x39   :  { %75 = dma.vmem_to_smem %s73_s15, 16, %s1261_s20, [#allocation9]  }
  0x3a   :  { %p1190_p11 = scmp.ne.s32.totalorder %s83_s18, %s1189_s21  ;;  %p1194_p12 = scmp.lt.s32.totalorder %s83_s18, %s83_s18 }
  0x3b   :  { %p1195_p13 = scmp.lt.s32.totalorder %s1189_s21, %s1189_s21 }
  0x3d   :  { %p1196_p0 = por %p1195_p13, %p1194_p12 }
  0x3f   :  { %p1197_p1 = pnand %p1196_p0, %p1190_p11 }
  0x41   :  { %1200 = shalt.err (!%p1197_p1)
}
  0x42   :  { %s1262_s4 = smov [#allocation11]  }
  0x43   :  { %85 = dma.vmem_to_smem %s83_s18, 16, %s1262_s4, [#allocation12]  }
  0x44   :  { %1245 = dma.done.wait [#allocation4], 16  }
  0x45   :  { %1246 = vsyncadd [#allocation4], 4294967280 }
  0x46   :  { %1247 = dma.done.wait [#allocation6], 32  }
  0x47   :  { %1248 = vsyncadd [#allocation6], 4294967264 }
  0x48   :  { %1249 = dma.done.wait [#allocation9], 32  }
  0x49   :  { %1250 = vsyncadd [#allocation9], 4294967264 }
  0x4a   :  { %1251 = dma.done.wait [#allocation12], 16  }
  0x4b   :  { %1252 = vsyncadd [#allocation12], 4294967280 }
  0x4c   :  { %116 = sfence }
  0x4d   :  { %v1363_v0 = vld [vmem:[%s1669_s9] sm:$0xff]  ;;  %v122_v1 = vld [vmem:[%s1669_s9 + $0x8] sm:$0xff]  ;;  %v1371_v2 = vld [vmem:[%s1669_s9 + $0x10] sm:$0xff]  ;;  %vm137_vm0 = vcmask 261120   ;;  %vm231_vm1 = vcmask 130048   ;;  %s221_s24 = sld [smem:[#allocation2]] }
  0x4e   :  { %129 = vst [vmem:[%s1672_s12] sm:$0xff] %v1363_v0  ;;  %130 = vst [vmem:[%s1672_s12 + $0x8] sm:$0xff] %v122_v1  ;;  %v1083_v3 = vpack.c.bf16 %v122_v1, %v1363_v0  ;;  %v1384_v4 = vld [vmem:[%s1669_s9 + $0x18] sm:$0xff]  ;;  %v1393_v5 = vld [vmem:[%s1666_s6] sm:$0xff]  ;;  %s333_s15 = sld [smem:[#allocation10]]  ;;  %s950_s23 = sld [smem:[#allocation2 + $0x1]] }
  0x4f   :  { %131 = vst [vmem:[%s1672_s12 + $0x10] sm:$0xff] %v1371_v2  ;;  %132 = vst [vmem:[%s1672_s12 + $0x18] sm:$0xff] %v1384_v4  ;;  %v1087_v6 = vpack.c.bf16 %v1384_v4, %v1371_v2  ;;  %1028 = vmatprep.mubr.msk.f32.mxu0 %vm137_vm0, %v1393_v5  ;;  %v1406_v7 = vld [vmem:[%s1670_s10 + $0x8] sm:$0xff]  ;;  %v1420_v9 = vld [vmem:[%s1670_s10] sm:$0xff]  ;;  %s445_s3 = sld [smem:[#allocation5]]  ;;  %s966_s20 = sld [smem:[#allocation5 + $0x1]] }
  0x50   :  { %1084 = vmatprep.subr.bf16.mxu0 %v1083_v3  ;;  %134 = vst [vmem:[#allocation13 + $0x8] sm:$0xff] %v1406_v7  ;;  %366 = vst [vmem:[#allocation13 + $0x18] sm:$0xff] %v1406_v7  ;;  %v1413_v8 = vld [vmem:[%s1666_s6 + $0x8] sm:$0xff]  ;;  %v1427_v10 = vld [vmem:[%s1671_s11] sm:$0xff]  ;;  %s455_s22 = sld [smem:[#allocation8]]  ;;  %s967_s21 = sld [smem:[#allocation8 + $0x1]] }
  0x51   :  { %1086 = vmatpush3.bf16.msra.mxu0 %v1083_v3  ;;  %133 = vst [vmem:[#allocation13] sm:$0xff] %v1420_v9  ;;  %365 = vst [vmem:[#allocation13 + $0x10] sm:$0xff] %v1420_v9  ;;  %v1432_v11 = vld [vmem:[%s1671_s11 + $0x8] sm:$0xff]  ;;  %v227_v12 = vld [vmem:[%s1668_s8] sm:$0xff]  ;;  %s461_s6 = sld [smem:[#allocation11]]  ;;  %s968_s4 = sld [smem:[#allocation11 + $0x1]] }
  0x52   :  { %1088 = vmatprep.subr.bf16.mxu0 %v1087_v6  ;;  %135 = vst [vmem:[#allocation14] sm:$0xff] %v1427_v10  ;;  %136 = vst [vmem:[#allocation14 + $0x8] sm:$0xff] %v1432_v11  ;;  %1035 = vmatprep.mubr.msk.f32.mxu1 %vm231_vm1, %v227_v12  ;;  %v1445_v13 = vld [vmem:[%s1667_s7 + $0x8] sm:$0xff]  ;;  %v1451_v16 = vld [vmem:[%s1667_s7] sm:$0xff]  ;;  %s479_s10 = sld [smem:[#allocation7]]  ;;  %s959_s7 = sld [smem:[#allocation10 + $0x1]] }
  0x53   :  { %368 = vst [vmem:[#allocation14 + $0x10] sm:$0xff] %v1427_v10  ;;  %369 = vst [vmem:[#allocation14 + $0x18] sm:$0xff] %v1432_v11  ;;  %v222_v18 = vstv %s221_s24  ;;  %v228_v27 = vld [vmem:[%s1668_s8 + $0x8] sm:$0xff]  ;;  %v229_v28 = vld [vmem:[%s1668_s8 + $0x10] sm:$0xff]  ;;  %s969_s5 = sld [smem:[#allocation7 + $0x1]]  ;;  %s970_s1 = sld [smem:[#allocation2 + $0x2]] }
  0x54   :  { %v230_v29 = vld [vmem:[%s1668_s8 + $0x18] sm:$0xff]  ;;  %v334_v31 = vstv %s333_s15  ;;  %s1263_s25 = smov [#allocation13]   ;;  %s1264_s11 = smov [#allocation14]  }
  0x55   :  { %1090 = vmatpush3.bf16.msra.mxu0 %v1087_v6  ;;  %v450_v6 = vstv %s445_s3  ;;  %s905_s26 = sshll.u32 %s1263_s25, 4  ;;  %s917_s27 = sshll.u32 %s1264_s11, 4  ;;  %s906_s26 = int_to_ptr.vmem [resolvable:$true] %s905_s26  ;;  %s1613_s27 = int_to_ptr.vmem [resolvable:$true] %s917_s27 }
  0x56   :  { %s1201_s28 = scalar_lea.vmem %s906_s26, 1024  ;;  %p1206_p3 = scmp.lt.s32.totalorder %s906_s26, %s906_s26 }
  0x57   :  { %p1202_p2 = scmp.ne.s32.totalorder %s906_s26, %s1201_s28  ;;  %p1207_p4 = scmp.lt.s32.totalorder %s1201_s28, %s1201_s28 }
  0x58   :  { %1029 = vmatmul.mubr.msk.f32.vlgmr.msra.gmra.mrb[0].mxu0 %vm137_vm0, %v1413_v8 }
  0x59   :  { %p1208_p5 = por %p1207_p4, %p1206_p3 }
  0x5b   :  { %p1209_p6 = pnand %p1208_p5, %p1202_p2 }
 0x12b   :  { %v1030_v14 = vpop.f32.mrb[0].mxu0 }
 0x12c   :  { %v216_v15 = vadd.f32 %v1030_v14, %v1406_v7  ;;  %v210_v17 = vpop.f32.mrb[1].mxu0 }
 0x12d   :  { %v211_v19 = vadd.f32 %v210_v17, %v1420_v9 }
 0x12e   :  { %v220_v20 = vsub.f32 %v216_v15, %v1445_v13 }
 0x12f   :  { %v219_v21 = vsub.f32 %v211_v19, %v1451_v16 }
 0x130   :  { %v224_v22 = vmul.f32 %v222_v18, %v220_v20 }
 0x131   :  { %v223_v23 = vmul.f32 %v222_v18, %v219_v21  ;;  %v456_v18 = vstv %s455_s22 }
 0x132   :  { %v226_v24 = vadd.f32 %v224_v22, %v1432_v11 }
 0x133   :  { %v225_v25 = vadd.f32 %v223_v23, %v1427_v10  ;;  %v462_v23 = vstv %s461_s6 }
 0x135   :  { %v1091_v26 = vpack.c.bf16 %v226_v24, %v225_v25 }
 0x137   :  { %1092 = vmatprep.subr.bf16.mxu1 %v1091_v26 }
 0x138   :  { %1094 = vmatpush3.bf16.msra.mxu1 %v1091_v26 }
 0x13b   :  { %1036 = vmatmul.mubr.msk.f32.vlgmr.msra.gmra.mrb[0].mxu1 %vm231_vm1, %v228_v27 }
 0x13c   :  { %1038 = vmatprep.mubr.msk.f32.mxu1 %vm231_vm1, %v229_v28 }
 0x13f   :  { %1039 = vmatmul.mubr.msk.f32.gmra.mrb[2].mxu1 %vm231_vm1, %v230_v29 }
 0x140   :  { %1049 = vmatprep.mubr.msk.f32.mxu1 %vm137_vm0, %v1393_v5 }
 0x20e   :  { %v1037_v30 = vpop.f32.mrb[0].mxu1 }
 0x20f   :  { %v330_v32 = vsub.f32 %v122_v1, %v1037_v30  ;;  %v310_v33 = vpop.f32.mrb[1].mxu1  ;;  %v951_v1 = vld [vmem:[%s1668_s8 + $0x20] sm:$0xff] }
 0x210   :  { %v329_v34 = vsub.f32 %v1363_v0, %v310_v33  ;;  %1056 = vmatprep.mubr.msk.f32.mxu0 %vm231_vm1, %v951_v1 }
 0x211   :  { %v336_v35 = vsub.f32 %v330_v32, %v334_v31  ;;  %v344_v36 = vsub.f32 0.0, %v330_v32 }
 0x212   :  { %v335_v37 = vsub.f32 %v329_v34, %v334_v31  ;;  %v343_v38 = vsub.f32 0.0, %v329_v34  ;;  %v1040_v39 = vpop.f32.mrb[2].mxu1 }
 0x213   :  { %v348_v40 = vsub.f32 %v344_v36, %v334_v31  ;;  %v332_v41 = vsub.f32 %v1384_v4, %v1040_v39  ;;  %v320_v42 = vpop.f32.mrb[3].mxu1  ;;  %v340_v45 = vmax.f32 %v336_v35, 0.0 }
 0x214   :  { %v347_v43 = vsub.f32 %v343_v38, %v334_v31  ;;  %v331_v44 = vsub.f32 %v1371_v2, %v320_v42  ;;  %v339_v49 = vmax.f32 %v335_v37, 0.0 }
 0x215   :  { %v352_v46 = vmax.f32 %v348_v40, 0.0  ;;  %v338_v47 = vsub.f32 %v332_v41, %v334_v31  ;;  %v346_v48 = vsub.f32 0.0, %v332_v41  ;;  %v486_v41 = vstv %s950_s23 }
 0x216   :  { %v351_v50 = vmax.f32 %v347_v43, 0.0  ;;  %v337_v51 = vsub.f32 %v331_v44, %v334_v31  ;;  %v345_v52 = vsub.f32 0.0, %v331_v44 }
 0x217   :  { %v1475_v53 = vsub.f32 %v340_v45, %v352_v46  ;;  %v350_v54 = vsub.f32 %v346_v48, %v334_v31  ;;  %v342_v57 = vmax.f32 %v338_v47, 0.0 }
 0x218   :  { %v1477_v55 = vsub.f32 %v339_v49, %v351_v50  ;;  %v349_v56 = vsub.f32 %v345_v52, %v334_v31  ;;  %v341_v59 = vmax.f32 %v337_v51, 0.0  ;;  %v954_v52 = vld [vmem:[%s1668_s8 + $0x38] sm:$0xff] }
 0x219   :  { %945 = vst [vmem:[%s1672_s12 + $0x28] sm:$0xff] %v1475_v53  ;;  %v354_v58 = vmax.f32 %v350_v54, 0.0 }
 0x21a   :  { %944 = vst [vmem:[%s1672_s12 + $0x20] sm:$0xff] %v1477_v55  ;;  %v353_v60 = vmax.f32 %v349_v56, 0.0  ;;  %v1095_v61 = vpack.c.bf16 %v1475_v53, %v1477_v55  ;;  %v598_v56 = vstv %s959_s7 }
 0x21b   :  { %v1489_v62 = vsub.f32 %v342_v57, %v354_v58 }
 0x21c   :  { %v1491_v63 = vsub.f32 %v341_v59, %v353_v60  ;;  %1096 = vmatprep.subr.bf16.mxu1 %v1095_v61 }
 0x21d   :  { %947 = vst [vmem:[%s1672_s12 + $0x38] sm:$0xff] %v1489_v62  ;;  %1098 = vmatpush3.bf16.msra.mxu1 %v1095_v61 }
 0x21e   :  { %946 = vst [vmem:[%s1672_s12 + $0x30] sm:$0xff] %v1491_v63  ;;  %v1099_v0 = vpack.c.bf16 %v1489_v62, %v1491_v63 }
 0x220   :  { %1100 = vmatprep.subr.bf16.mxu1 %v1099_v0 }
 0x221   :  { %1102 = vmatpush3.bf16.msra.mxu1 %v1099_v0 }
 0x224   :  { %1050 = vmatmul.mubr.msk.f32.vlgmr.msra.gmra.mrb[4].mxu1 %vm137_vm0, %v1413_v8 }
 0x2f7   :  { %v1051_v2 = vpop.f32.mrb[4].mxu1 }
 0x2f8   :  { %v447_v3 = vadd.f32 %v1051_v2, %v1406_v7  ;;  %v436_v4 = vpop.f32.mrb[5].mxu1 }
 0x2f9   :  { %v446_v12 = vadd.f32 %v436_v4, %v1420_v9 }
 0x2fa   :  { %v449_v14 = vsub.f32 %v447_v3, %v1445_v13 }
 0x2fb   :  { %v448_v15 = vsub.f32 %v446_v12, %v1451_v16 }
 0x2fc   :  { %v452_v17 = vmul.f32 %v450_v6, %v449_v14 }
 0x2fd   :  { %v451_v19 = vmul.f32 %v450_v6, %v448_v15 }
 0x2fe   :  { %v454_v20 = vadd.f32 %v452_v17, %v1432_v11 }
 0x2ff   :  { %v453_v21 = vadd.f32 %v451_v19, %v1427_v10 }
 0x300   :  { %v458_v22 = vmul.f32 %v456_v18, %v454_v20 }
 0x301   :  { %v457_v24 = vmul.f32 %v456_v18, %v453_v21 }
 0x302   :  { %v460_v25 = vsub.f32 %v1406_v7, %v458_v22 }
 0x303   :  { %v459_v26 = vsub.f32 %v1420_v9, %v457_v24  ;;  %v480_v9 = vstv %s479_s10 }
 0x304   :  { %v464_v27 = vsub.f32 %v460_v25, %v462_v23  ;;  %v468_v28 = vsub.f32 0.0, %v460_v25 }
 0x305   :  { %v463_v29 = vsub.f32 %v459_v26, %v462_v23  ;;  %v467_v30 = vsub.f32 0.0, %v459_v26 }
 0x306   :  { %v470_v31 = vsub.f32 %v468_v28, %v462_v23  ;;  %v466_v33 = vmax.f32 %v464_v27, 0.0 }
 0x307   :  { %v469_v32 = vsub.f32 %v467_v30, %v462_v23  ;;  %v465_v35 = vmax.f32 %v463_v29, 0.0 }
 0x308   :  { %v472_v34 = vmax.f32 %v470_v31, 0.0  ;;  %v971_v31 = vld [vmem:[%s1668_s8 + $0x40] sm:$0xff] }
 0x309   :  { %v471_v36 = vmax.f32 %v469_v32, 0.0  ;;  %1077 = vmatprep.mubr.msk.f32.mxu1 %vm231_vm1, %v971_v31 }
 0x30a   :  { %v1517_v37 = vsub.f32 %v466_v33, %v472_v34 }
 0x30b   :  { %v1519_v38 = vsub.f32 %v465_v35, %v471_v36  ;;  %v714_v35 = vstv %s966_s20 }
 0x30c   :  { %v476_v7 = vadd.f32 %v1051_v2, %v1517_v37  ;;  %630 = vst [vmem:[#allocation13 + $0x28] sm:$0xff] %v1517_v37 }
 0x30d   :  { %v475_v39 = vadd.f32 %v1519_v38, %v436_v4  ;;  %629 = vst [vmem:[#allocation13 + $0x20] sm:$0xff] %v1519_v38 }
 0x30e   :  { %v478_v40 = vsub.f32 %v476_v7, %v1445_v13 }
 0x30f   :  { %v477_v42 = vsub.f32 %v475_v39, %v1451_v16  ;;  %v720_v39 = vstv %s967_s21 }
 0x310   :  { %v482_v43 = vmul.f32 %v480_v9, %v478_v40  ;;  %v488_v46 = vmul.f32 %v486_v41, %v478_v40 }
 0x311   :  { %v481_v44 = vmul.f32 %v480_v9, %v477_v42  ;;  %v487_v48 = vmul.f32 %v486_v41, %v477_v42 }
 0x312   :  { %v1528_v45 = vadd.f32 %v482_v43, %v1432_v11  ;;  %v952_v11 = vld [vmem:[%s1668_s8 + $0x28] sm:$0xff] }
 0x313   :  { %v1531_v47 = vadd.f32 %v481_v44, %v1427_v10  ;;  %v953_v10 = vld [vmem:[%s1668_s8 + $0x30] sm:$0xff]  ;;  %v726_v44 = vstv %s968_s4 }
 0x314   :  { %633 = vst [vmem:[#allocation14 + $0x28] sm:$0xff] %v1528_v45  ;;  %v490_v49 = vadd.f32 %v488_v46, %v1528_v45 }
 0x315   :  { %632 = vst [vmem:[#allocation14 + $0x20] sm:$0xff] %v1531_v47  ;;  %v489_v50 = vadd.f32 %v487_v48, %v1531_v47 }
 0x317   :  { %v1103_v51 = vpack.c.bf16 %v490_v49, %v489_v50 }
 0x319   :  { %1104 = vmatprep.subr.bf16.mxu0 %v1103_v51 }
 0x31a   :  { %1106 = vmatpush3.bf16.msra.mxu0 %v1103_v51 }
 0x31d   :  { %1057 = vmatmul.mubr.msk.f32.vlgmr.msra.gmra.mrb[2].mxu0 %vm231_vm1, %v952_v11 }
 0x31e   :  { %1059 = vmatprep.mubr.msk.f32.mxu0 %vm231_vm1, %v953_v10 }
 0x321   :  { %1060 = vmatmul.mubr.msk.f32.gmra.mrb[4].mxu0 %vm231_vm1, %v954_v52 }
 0x322   :  { %1070 = vmatprep.mubr.msk.f32.mxu0 %vm137_vm0, %v1393_v5 }
 0x3f0   :  { %v1058_v54 = vpop.f32.mrb[2].mxu0 }
 0x3f1   :  { %v594_v57 = vsub.f32 %v1475_v53, %v1058_v54  ;;  %v574_v58 = vpop.f32.mrb[3].mxu0 }
 0x3f2   :  { %v593_v59 = vsub.f32 %v1477_v55, %v574_v58 }
 0x3f3   :  { %v600_v60 = vsub.f32 %v594_v57, %v598_v56  ;;  %v608_v61 = vsub.f32 0.0, %v594_v57 }
 0x3f4   :  { %v599_v0 = vsub.f32 %v593_v59, %v598_v56  ;;  %v607_v1 = vsub.f32 0.0, %v593_v59  ;;  %v1061_v2 = vpop.f32.mrb[4].mxu0 }
 0x3f5   :  { %v612_v3 = vsub.f32 %v608_v61, %v598_v56  ;;  %v596_v4 = vsub.f32 %v1489_v62, %v1061_v2  ;;  %v584_v6 = vpop.f32.mrb[5].mxu0  ;;  %v604_v14 = vmax.f32 %v600_v60, 0.0 }
 0x3f6   :  { %v611_v12 = vsub.f32 %v607_v1, %v598_v56  ;;  %v595_v5 = vsub.f32 %v1491_v63, %v584_v6  ;;  %v603_v53 = vmax.f32 %v599_v0, 0.0 }
 0x3f7   :  { %v616_v15 = vmax.f32 %v612_v3, 0.0  ;;  %v602_v17 = vsub.f32 %v596_v4, %v598_v56  ;;  %v610_v18 = vsub.f32 0.0, %v596_v4  ;;  %v750_v3 = vstv %s970_s1 }
 0x3f8   :  { %v615_v19 = vmax.f32 %v611_v12, 0.0  ;;  %v601_v20 = vsub.f32 %v595_v5, %v598_v56  ;;  %v609_v55 = vsub.f32 0.0, %v595_v5 }
 0x3f9   :  { %v1555_v21 = vsub.f32 %v604_v14, %v616_v15  ;;  %v614_v22 = vsub.f32 %v610_v18, %v598_v56  ;;  %v606_v62 = vmax.f32 %v602_v17, 0.0 }
 0x3fa   :  { %v1557_v23 = vsub.f32 %v603_v53, %v615_v19  ;;  %v613_v24 = vsub.f32 %v609_v55, %v598_v56  ;;  %v605_v25 = vmax.f32 %v601_v20, 0.0 }
 0x3fb   :  { %961 = vst [vmem:[%s1672_s12 + $0x48] sm:$0xff] %v1555_v21  ;;  %v618_v63 = vmax.f32 %v614_v22, 0.0 }
 0x3fc   :  { %960 = vst [vmem:[%s1672_s12 + $0x40] sm:$0xff] %v1557_v23  ;;  %v617_v26 = vmax.f32 %v613_v24, 0.0  ;;  %v1107_v27 = vpack.c.bf16 %v1555_v21, %v1557_v23 }
 0x3fd   :  { %v1569_v28 = vsub.f32 %v606_v62, %v618_v63 }
 0x3fe   :  { %v1571_v29 = vsub.f32 %v605_v25, %v617_v26  ;;  %1108 = vmatprep.subr.bf16.mxu0 %v1107_v27 }
 0x3ff   :  { %963 = vst [vmem:[%s1672_s12 + $0x58] sm:$0xff] %v1569_v28  ;;  %1110 = vmatpush3.bf16.msra.mxu0 %v1107_v27 }
 0x400   :  { %962 = vst [vmem:[%s1672_s12 + $0x50] sm:$0xff] %v1571_v29  ;;  %v1111_v30 = vpack.c.bf16 %v1569_v28, %v1571_v29 }
 0x402   :  { %1112 = vmatprep.subr.bf16.mxu0 %v1111_v30 }
 0x403   :  { %1114 = vmatpush3.bf16.msra.mxu0 %v1111_v30 }
 0x406   :  { %1071 = vmatmul.mubr.msk.f32.vlgmr.msra.gmra.mrb[6].mxu0 %vm137_vm0, %v1413_v8 }
 0x4d9   :  { %v1072_v32 = vpop.f32.mrb[6].mxu0 }
 0x4da   :  { %v711_v33 = vadd.f32 %v1072_v32, %v1517_v37  ;;  %v700_v34 = vpop.f32.mrb[7].mxu0 }
 0x4db   :  { %v710_v36 = vadd.f32 %v700_v34, %v1519_v38 }
 0x4dc   :  { %v713_v7 = vsub.f32 %v711_v33, %v1445_v13 }
 0x4dd   :  { %v712_v8 = vsub.f32 %v710_v36, %v1451_v16 }
 0x4de   :  { %v716_v9 = vmul.f32 %v714_v35, %v713_v7 }
 0x4df   :  { %v715_v40 = vmul.f32 %v714_v35, %v712_v8 }
 0x4e0   :  { %v718_v41 = vadd.f32 %v716_v9, %v1528_v45 }
 0x4e1   :  { %v717_v42 = vadd.f32 %v715_v40, %v1531_v47 }
 0x4e2   :  { %v722_v43 = vmul.f32 %v720_v39, %v718_v41 }
 0x4e3   :  { %v721_v46 = vmul.f32 %v720_v39, %v717_v42 }
 0x4e4   :  { %v724_v48 = vsub.f32 %v1517_v37, %v722_v43  ;;  %v744_v37 = vstv %s969_s5 }
 0x4e5   :  { %v723_v49 = vsub.f32 %v1519_v38, %v721_v46 }
 0x4e6   :  { %v728_v50 = vsub.f32 %v724_v48, %v726_v44  ;;  %v732_v51 = vsub.f32 0.0, %v724_v48 }
 0x4e7   :  { %v727_v11 = vsub.f32 %v723_v49, %v726_v44  ;;  %v731_v10 = vsub.f32 0.0, %v723_v49 }
 0x4e8   :  { %v734_v52 = vsub.f32 %v732_v51, %v726_v44  ;;  %v730_v56 = vmax.f32 %v728_v50, 0.0 }
 0x4e9   :  { %v733_v54 = vsub.f32 %v731_v10, %v726_v44  ;;  %v729_v58 = vmax.f32 %v727_v11, 0.0 }
 0x4ea   :  { %v736_v57 = vmax.f32 %v734_v52, 0.0 }
 0x4eb   :  { %v735_v59 = vmax.f32 %v733_v54, 0.0 }
 0x4ec   :  { %v738_v60 = vsub.f32 %v730_v56, %v736_v57 }
 0x4ed   :  { %v737_v61 = vsub.f32 %v729_v58, %v735_v59 }
 0x4ee   :  { %v740_v0 = vadd.f32 %v1072_v32, %v738_v60  ;;  %894 = vst [vmem:[#allocation13 + $0x38] sm:$0xff] %v738_v60 }
 0x4ef   :  { %v739_v1 = vadd.f32 %v737_v61, %v700_v34  ;;  %893 = vst [vmem:[#allocation13 + $0x30] sm:$0xff] %v737_v61 }
 0x4f0   :  { %v742_v38 = vsub.f32 %v740_v0, %v1445_v13  ;;  %v972_v13 = vld [vmem:[%s1668_s8 + $0x48] sm:$0xff] }
 0x4f1   :  { %v741_v2 = vsub.f32 %v739_v1, %v1451_v16  ;;  %v973_v16 = vld [vmem:[%s1668_s8 + $0x50] sm:$0xff] }
 0x4f2   :  { %v746_v4 = vmul.f32 %v744_v37, %v742_v38  ;;  %v752_v12 = vmul.f32 %v750_v3, %v742_v38 }
 0x4f3   :  { %v745_v6 = vmul.f32 %v744_v37, %v741_v2  ;;  %v751_v15 = vmul.f32 %v750_v3, %v741_v2 }
 0x4f4   :  { %v748_v5 = vadd.f32 %v746_v4, %v1528_v45  ;;  %v974_v45 = vld [vmem:[%s1668_s8 + $0x58] sm:$0xff] }
 0x4f5   :  { %v747_v14 = vadd.f32 %v745_v6, %v1531_v47 }
 0x4f6   :  { %v754_v17 = vadd.f32 %v752_v12, %v748_v5  ;;  %897 = vst [vmem:[#allocation14 + $0x38] sm:$0xff] %v748_v5 }
 0x4f7   :  { %896 = vst [vmem:[#allocation14 + $0x30] sm:$0xff] %v747_v14  ;;  %v753_v18 = vadd.f32 %v751_v15, %v747_v14 }
 0x4f9   :  { %v1115_v53 = vpack.c.bf16 %v754_v17, %v753_v18 }
 0x4fb   :  { %1116 = vmatprep.subr.bf16.mxu1 %v1115_v53 }
 0x4fc   :  { %1118 = vmatpush3.bf16.msra.mxu1 %v1115_v53 }
 0x4ff   :  { %1078 = vmatmul.mubr.msk.f32.vlgmr.msra.gmra.mrb[6].mxu1 %vm231_vm1, %v972_v13 }
 0x500   :  { %1080 = vmatprep.mubr.msk.f32.mxu1 %vm231_vm1, %v973_v16 }
 0x503   :  { %1081 = vmatmul.mubr.msk.f32.gmra.mrb[8].mxu1 %vm231_vm1, %v974_v45 }
 0x504   :  { %1212 = shalt.err (!%p1209_p6)
}
 0x505   :  { %s1213_s8 = scalar_lea.hbm %s1673_s13, 1024 }
 0x506   :  { %p1214_p7 = scmp.ne.s32.totalorder %s1673_s13, %s1213_s8  ;;  %p1217_p8 = scmp.lt.u32.totalorder %s1213_s8, %s1673_s13 }
 0x508   :  { %p1219_p9 = pnand %p1217_p8, %p1214_p7 }
 0x50a   :  { %1222 = shalt.err (!%p1219_p9)
}
 0x50b   :  { %s1265_s16 = smov 128   ;;  %s1266_s17 = smov 8  }
 0x50c   :  { %911 = dma.vmem_to_hbm [thread:$0]  %s906_s26, 1024, %s1673_s13, [#allocation3], %s1265_s16, %s1265_s16, %s1266_s17  }
 0x50d   :  { %s1223_s19 = scalar_lea.vmem %s1613_s27, 1024  ;;  %p1228_p11 = scmp.lt.s32.totalorder %s1613_s27, %s1613_s27 }
 0x50e   :  { %p1224_p10 = scmp.ne.s32.totalorder %s1613_s27, %s1223_s19  ;;  %p1229_p12 = scmp.lt.s32.totalorder %s1223_s19, %s1223_s19 }
 0x510   :  { %p1230_p13 = por %p1229_p12, %p1228_p11 }
 0x512   :  { %p1231_p0 = pnand %p1230_p13, %p1224_p10 }
 0x514   :  { %1234 = shalt.err (!%p1231_p0)
}
 0x515   :  { %s1235_s4 = scalar_lea.hbm %s1674_s14, 1024 }
 0x516   :  { %p1236_p1 = scmp.ne.s32.totalorder %s1674_s14, %s1235_s4  ;;  %p1239_p2 = scmp.lt.u32.totalorder %s1235_s4, %s1674_s14 }
 0x518   :  { %p1241_p3 = pnand %p1239_p2, %p1236_p1 }
 0x51a   :  { %1244 = shalt.err (!%p1241_p3)
}
 0x51b   :  { %923 = dma.vmem_to_hbm [thread:$0]  %s1613_s27, 1024, %s1674_s14, [#allocation15], %s1265_s16, %s1265_s16, %s1266_s17  }
 0x51c   :  { %s979_s10 = sld [smem:[#allocation10 + $0x2]] }
 0x522   :  { %v862_v19 = vstv %s979_s10 }
 0x5d2   :  { %v1079_v47 = vpop.f32.mrb[6].mxu1 }
 0x5d3   :  { %v858_v20 = vsub.f32 %v1555_v21, %v1079_v47  ;;  %v838_v55 = vpop.f32.mrb[7].mxu1 }
 0x5d4   :  { %v857_v22 = vsub.f32 %v1557_v23, %v838_v55 }
 0x5d5   :  { %v864_v24 = vsub.f32 %v858_v20, %v862_v19  ;;  %v872_v62 = vsub.f32 0.0, %v858_v20 }
 0x5d6   :  { %v863_v63 = vsub.f32 %v857_v22, %v862_v19  ;;  %v871_v25 = vsub.f32 0.0, %v857_v22  ;;  %v1082_v26 = vpop.f32.mrb[8].mxu1 }
 0x5d7   :  { %v876_v27 = vsub.f32 %v872_v62, %v862_v19  ;;  %v860_v30 = vsub.f32 %v1569_v28, %v1082_v26  ;;  %v848_v31 = vpop.f32.mrb[9].mxu1  ;;  %v868_v34 = vmax.f32 %v864_v24, 0.0 }
 0x5d8   :  { %v875_v32 = vsub.f32 %v871_v25, %v862_v19  ;;  %v859_v33 = vsub.f32 %v1571_v29, %v848_v31  ;;  %v867_v21 = vmax.f32 %v863_v63, 0.0 }
 0x5d9   :  { %v880_v35 = vmax.f32 %v876_v27, 0.0  ;;  %v866_v36 = vsub.f32 %v860_v30, %v862_v19  ;;  %v874_v7 = vsub.f32 0.0, %v860_v30 }
 0x5da   :  { %v879_v8 = vmax.f32 %v875_v32, 0.0  ;;  %v865_v9 = vsub.f32 %v859_v33, %v862_v19  ;;  %v873_v23 = vsub.f32 0.0, %v859_v33 }
 0x5db   :  { %v884_v39 = vsub.f32 %v868_v34, %v880_v35  ;;  %v878_v40 = vsub.f32 %v874_v7, %v862_v19  ;;  %v870_v28 = vmax.f32 %v866_v36, 0.0 }
 0x5dc   :  { %v883_v41 = vsub.f32 %v867_v21, %v879_v8  ;;  %v877_v42 = vsub.f32 %v873_v23, %v862_v19  ;;  %v869_v29 = vmax.f32 %v865_v9, 0.0 }
 0x5dd   :  { %981 = vst [vmem:[%s1672_s12 + $0x68] sm:$0xff] %v884_v39  ;;  %v882_v43 = vmax.f32 %v878_v40, 0.0 }
 0x5de   :  { %980 = vst [vmem:[%s1672_s12 + $0x60] sm:$0xff] %v883_v41  ;;  %v881_v44 = vmax.f32 %v877_v42, 0.0 }
 0x5df   :  { %v886_v46 = vsub.f32 %v870_v28, %v882_v43 }
 0x5e0   :  { %v885_v48 = vsub.f32 %v869_v29, %v881_v44 }
 0x5e1   :  { %983 = vst [vmem:[%s1672_s12 + $0x78] sm:$0xff] %v886_v46 }
 0x5e2   :  { %982 = vst [vmem:[%s1672_s12 + $0x70] sm:$0xff] %v885_v48 }
 0x5e3   :  { %1253 = dma.done.wait [#allocation3], 1024  }
 0x5e4   :  { %1254 = vsyncadd [#allocation3], 4294966272 }
 0x5e5   :  { %1255 = dma.done.wait [#allocation15], 1024  }
 0x5e6   :  { %1256 = vsyncadd [#allocation15], 4294966272 }
 0x5e7   :  { %932 = vsyncpa [#allocation3], 1 }
 0x5e8   :  { %933 = vsyncpa [#allocation15], 1 }
 0x5e9   :  { %934 = vsyncpa [#allocation4], 1 }
 0x5ea   :  { %935 = vsyncpa [#allocation6], 1 }
 0x5eb   :  { %936 = vsyncpa [#allocation9], 1 }
 0x5ec   :  { %937 = vsyncpa [#allocation12], 1 }

</bundles_post_ra>
